<compile_context>
chip_gen: v7x
topology: tpu7x:2x2x1
jax: 0.10.0
libtpu: 0.0.40
codegen_flags: <defaults>
</compile_context>

<pallas_src>
import functools

import jax
import jax.numpy as jnp
from jax.experimental import pallas as pl
from jax.experimental.pallas import tpu as pltpu

# -------- model hyperparameters (mirrors the PyTorch module) --------
HIDDEN_SIZE = 32
NUM_HEADS = 8          # qkv_proj out_features = num_heads * 3 = 24
DROPOUT_P = 0.1


def _fused_attn_kernel(x_ref, wq_ref, wk_ref, wv_ref, bq_ref, bk_ref, bv_ref,
                       bits_ref, o_ref, *, batch, seq, nh, scale, dropout_p,
                       use_approx_recip):
    # x_ref: (B*S, H); w*_ref: (H, nh); b*_ref: (1, nh)
    # bits_ref: (B, S, S) int32 in [0, 2^24); o_ref: (B, S, nh)
    x2d = x_ref[...]                                              # (B*S, H)

    # Fused QKV projection: one pass over x, three lane-0-aligned weights,
    # bias added once to the full (B*S, nh) result.
    q2d = jnp.dot(x2d, wq_ref[...], preferred_element_type=jnp.float32) + bq_ref[...]
    k2d = jnp.dot(x2d, wk_ref[...], preferred_element_type=jnp.float32) + bk_ref[...]
    v2d = jnp.dot(x2d, wv_ref[...], preferred_element_type=jnp.float32) + bv_ref[...]

    if dropout_p > 0.0:
        # Fold the 1/(1-p) keep-scale into v (S*nh muls instead of S*S per batch).
        v2d = v2d * jnp.float32(1.0 / (1.0 - dropout_p))
        thresh = jnp.int32(int(round(dropout_p * (1 << 24))))

    # Unrolled loop over the tiny batch (B=4): rank-2 dots only, slices land on
    # 8-sublane boundaries, so no relayout / cross-lane shuffles.
    for bidx in range(batch):
        rows = slice(bidx * seq, (bidx + 1) * seq)
        qb = q2d[rows, :]                                         # (S, nh)
        kb = k2d[rows, :]                                         # (S, nh)
        vb = v2d[rows, :]                                         # (S, nh)

        # scores = (q @ k^T) * hidden_size**-0.5   (contraction on head dim)
        s = jax.lax.dot_general(
            qb, kb, (((1,), (1,)), ((), ())),
            preferred_element_type=jnp.float32) * jnp.float32(scale)   # (S, S)

        # numerically stable softmax over the last dim
        s = s - jnp.max(s, axis=-1, keepdims=True)
        e = jnp.exp(s)
        denom = jnp.sum(e, axis=-1, keepdims=True)
        attn = e * pl.reciprocal(denom, approx=use_approx_recip)

        if dropout_p > 0.0:
            # TODO(synk): dropout RNG stream differs from PyTorch's; keep-prob
            # statistics and 1/(1-p) scaling semantics match.
            keep = bits_ref[bidx] >= thresh                       # (S, S) bool
            attn = jnp.where(keep, attn, jnp.float32(0.0))

        ob = jnp.dot(attn, vb, preferred_element_type=jnp.float32)    # (S, nh)
        o_ref[bidx] = ob.astype(o_ref.dtype)


def attention_forward(x, w, b, *, num_heads=NUM_HEADS, hidden_size=HIDDEN_SIZE,
                      dropout_p=DROPOUT_P, key=None):
    """x: (B, S, H) f32; w: (3*nh, H) torch-layout Linear weight; b: (3*nh,)."""
    B, S, H = x.shape
    nh = num_heads

    # Wrapper-side layout plumbing (free): fused batch*seq rows, split + transpose
    # the qkv weight so each of q/k/v is a lane-0-aligned (H, nh) operand.
    x2d = x.reshape(B * S, H)
    wq_t = w[0 * nh:1 * nh].T                  # (H, nh)
    wk_t = w[1 * nh:2 * nh].T                  # (H, nh)
    wv_t = w[2 * nh:3 * nh].T                  # (H, nh)
    bq = b[0 * nh:1 * nh].reshape(1, nh)
    bk = b[1 * nh:2 * nh].reshape(1, nh)
    bv = b[2 * nh:3 * nh].reshape(1, nh)

    # Dropout mask bits: drawn once host-side (works on TPU and in interpret
    # mode), thresholded in-kernel with an integer compare.
    if dropout_p > 0.0:
        if key is None:
            key = jax.random.PRNGKey(0)
        bits = jax.random.randint(key, (B, S, S), 0, 1 << 24, dtype=jnp.int32)
    else:
        bits = jnp.zeros((B, S, S), dtype=jnp.int32)   # unused by the kernel

    use_approx = jax.default_backend() == "tpu"    # EUP vrcp on TPU; exact elsewhere

    kernel = functools.partial(
        _fused_attn_kernel,
        batch=B, seq=S, nh=nh,
        scale=float(hidden_size) ** (-0.5),
        dropout_p=float(dropout_p),
        use_approx_recip=use_approx)

    return pl.pallas_call(
        kernel,
        out_shape=jax.ShapeDtypeStruct((B, S, nh), x.dtype),
        grid_spec=pltpu.PrefetchScalarGridSpec(
            num_scalar_prefetch=0,
            grid=(1,),                                   # single invocation
            in_specs=[
                pl.BlockSpec((B * S, H), lambda i: (0, 0)),
                pl.BlockSpec((H, nh), lambda i: (0, 0)),
                pl.BlockSpec((H, nh), lambda i: (0, 0)),
                pl.BlockSpec((H, nh), lambda i: (0, 0)),
                pl.BlockSpec((1, nh), lambda i: (0, 0)),
                pl.BlockSpec((1, nh), lambda i: (0, 0)),
                pl.BlockSpec((1, nh), lambda i: (0, 0)),
                pl.BlockSpec((B, S, S), lambda i: (0, 0, 0)),
            ],
            out_specs=pl.BlockSpec((B, S, nh), lambda i: (0, 0, 0)),
        ),
        compiler_params=pltpu.CompilerParams(
            dimension_semantics=("arbitrary",)),
    )(x2d, wq_t, wk_t, wv_t, bq, bk, bv, bits)


def _reference_no_dropout(x, w, b, *, num_heads=NUM_HEADS, hidden_size=HIDDEN_SIZE):
    nh = num_heads
    qkv = jnp.einsum("bsh,oh->bso", x, w) + b
    q, k, v = qkv[..., :nh], qkv[..., nh:2 * nh], qkv[..., 2 * nh:]
    scores = jnp.einsum("bqd,bkd->bqk", q, k) * (hidden_size ** -0.5)
    attn = jax.nn.softmax(scores, axis=-1)
    return jnp.einsum("bqk,bkd->bqd", attn, v)


if __name__ == "__main__":
    key = jax.random.PRNGKey(0)
    kx, kw, kb, kd = jax.random.split(key, 4)

    B, S, H = 4, 16, HIDDEN_SIZE
    x1 = jax.random.normal(kx, (B, S, H), dtype=jnp.float32)

    # Deterministic "Linear(hidden_size, num_heads*3)" parameters (torch layout).
    w = jax.random.normal(kw, (NUM_HEADS * 3, H), dtype=jnp.float32) * 0.1
    b = jax.random.normal(kb, (NUM_HEADS * 3,), dtype=jnp.float32) * 0.1

    # Correctness check against a pure-JAX reference with dropout disabled.
    out_nodrop = attention_forward(x1, w, b, dropout_p=0.0, key=kd)
    jax.block_until_ready(out_nodrop)
    ref = _reference_no_dropout(x1, w, b)
    assert out_nodrop.shape == (B, S, NUM_HEADS)
    assert jnp.allclose(out_nodrop, ref, atol=2e-3, rtol=2e-3), (
        "kernel deviates from reference")

    # Full forward with dropout (training-mode semantics) as in the module.
    out = attention_forward(x1, w, b, dropout_p=DROPOUT_P, key=kd)
    jax.block_until_ready(out)
    assert out.shape == (B, S, NUM_HEADS)
    assert bool(jnp.all(jnp.isfinite(out)))

    print("KERNEL_OK")
</pallas_src>

<mosaic_0001>
module attributes {stable_mosaic.version = 11 : i64} {
  func.func @_fused_attn_kernel(%arg0: i32, %arg1: memref<64x32xf32, #tpu.memory_space<vmem>>, %arg2: memref<32x8xf32, #tpu.memory_space<vmem>>, %arg3: memref<32x8xf32, #tpu.memory_space<vmem>>, %arg4: memref<32x8xf32, #tpu.memory_space<vmem>>, %arg5: memref<1x8xf32, #tpu.memory_space<vmem>>, %arg6: memref<1x8xf32, #tpu.memory_space<vmem>>, %arg7: memref<1x8xf32, #tpu.memory_space<vmem>>, %arg8: memref<4x16x16xi32, #tpu.memory_space<vmem>>, %arg9: memref<4x16x8xf32, #tpu.memory_space<vmem>>) attributes {dimension_semantics = [#tpu.dimension_semantics<arbitrary>], iteration_bounds = array<i64: 1>, scalar_prefetch = 0 : i64, scratch_operands = 0 : i64, tpu.core_type = #tpu.core_type<tc>, window_params = [{pipeline_mode = #tpu.pipeline_mode<synchronous>, transform_indices = @transform_0, window_bounds = array<i64: 64, 32>}, {pipeline_mode = #tpu.pipeline_mode<synchronous>, transform_indices = @transform_1, window_bounds = array<i64: 32, 8>}, {pipeline_mode = #tpu.pipeline_mode<synchronous>, transform_indices = @transform_2, window_bounds = array<i64: 32, 8>}, {pipeline_mode = #tpu.pipeline_mode<synchronous>, transform_indices = @transform_3, window_bounds = array<i64: 32, 8>}, {pipeline_mode = #tpu.pipeline_mode<synchronous>, transform_indices = @transform_4, window_bounds = array<i64: 1, 8>}, {pipeline_mode = #tpu.pipeline_mode<synchronous>, transform_indices = @transform_5, window_bounds = array<i64: 1, 8>}, {pipeline_mode = #tpu.pipeline_mode<synchronous>, transform_indices = @transform_6, window_bounds = array<i64: 1, 8>}, {pipeline_mode = #tpu.pipeline_mode<synchronous>, transform_indices = @transform_7, window_bounds = array<i64: 4, 16, 16>}, {pipeline_mode = #tpu.pipeline_mode<synchronous>, transform_indices = @transform_8, window_bounds = array<i64: 4, 16, 8>}]} {
    %c0 = arith.constant 0 : index
    %c0_0 = arith.constant 0 : index
    %0 = vector.load %arg1[%c0, %c0_0] : memref<64x32xf32, #tpu.memory_space<vmem>>, vector<64x32xf32>
    %c0_1 = arith.constant 0 : index
    %c0_2 = arith.constant 0 : index
    %1 = vector.load %arg2[%c0_1, %c0_2] : memref<32x8xf32, #tpu.memory_space<vmem>>, vector<32x8xf32>
    %cst = arith.constant dense<0.000000e+00> : vector<64x8xf32>
    %2 = tpu.matmul %0, %1, %cst {dimension_numbers = #tpu.dot_dimension_numbers<[1], [0], [0], [1], [0, 0, 1, 1], [], []>} : vector<64x32xf32>, vector<32x8xf32>, vector<64x8xf32> -> vector<64x8xf32>
    %c0_3 = arith.constant 0 : index
    %c0_4 = arith.constant 0 : index
    %3 = vector.load %arg5[%c0_3, %c0_4] : memref<1x8xf32, #tpu.memory_space<vmem>>, vector<1x8xf32>
    %4 = vector.broadcast %3 : vector<1x8xf32> to vector<64x8xf32>
    %5 = arith.addf %2, %4 : vector<64x8xf32>
    %c0_5 = arith.constant 0 : index
    %c0_6 = arith.constant 0 : index
    %6 = vector.load %arg3[%c0_5, %c0_6] : memref<32x8xf32, #tpu.memory_space<vmem>>, vector<32x8xf32>
    %cst_7 = arith.constant dense<0.000000e+00> : vector<64x8xf32>
    %7 = tpu.matmul %0, %6, %cst_7 {dimension_numbers = #tpu.dot_dimension_numbers<[1], [0], [0], [1], [0, 0, 1, 1], [], []>} : vector<64x32xf32>, vector<32x8xf32>, vector<64x8xf32> -> vector<64x8xf32>
    %c0_8 = arith.constant 0 : index
    %c0_9 = arith.constant 0 : index
    %8 = vector.load %arg6[%c0_8, %c0_9] : memref<1x8xf32, #tpu.memory_space<vmem>>, vector<1x8xf32>
    %9 = vector.broadcast %8 : vector<1x8xf32> to vector<64x8xf32>
    %10 = arith.addf %7, %9 : vector<64x8xf32>
    %c0_10 = arith.constant 0 : index
    %c0_11 = arith.constant 0 : index
    %11 = vector.load %arg4[%c0_10, %c0_11] : memref<32x8xf32, #tpu.memory_space<vmem>>, vector<32x8xf32>
    %cst_12 = arith.constant dense<0.000000e+00> : vector<64x8xf32>
    %12 = tpu.matmul %0, %11, %cst_12 {dimension_numbers = #tpu.dot_dimension_numbers<[1], [0], [0], [1], [0, 0, 1, 1], [], []>} : vector<64x32xf32>, vector<32x8xf32>, vector<64x8xf32> -> vector<64x8xf32>
    %c0_13 = arith.constant 0 : index
    %c0_14 = arith.constant 0 : index
    %13 = vector.load %arg7[%c0_13, %c0_14] : memref<1x8xf32, #tpu.memory_space<vmem>>, vector<1x8xf32>
    %14 = vector.broadcast %13 : vector<1x8xf32> to vector<64x8xf32>
    %15 = arith.addf %12, %14 : vector<64x8xf32>
    %16 = vector.extract_strided_slice %5 {offsets = [0, 0], sizes = [16, 8], strides = [1, 1]} : vector<64x8xf32> to vector<16x8xf32>
    %17 = vector.extract_strided_slice %10 {offsets = [0, 0], sizes = [16, 8], strides = [1, 1]} : vector<64x8xf32> to vector<16x8xf32>
    %18 = vector.extract_strided_slice %15 {offsets = [0, 0], sizes = [16, 8], strides = [1, 1]} : vector<64x8xf32> to vector<16x8xf32>
    %cst_15 = arith.constant dense<0.000000e+00> : vector<16x16xf32>
    %19 = tpu.matmul %16, %17, %cst_15 {dimension_numbers = #tpu.dot_dimension_numbers<[1], [1], [0], [0], [0, 0, 1, 0], [], []>} : vector<16x8xf32>, vector<16x8xf32>, vector<16x16xf32> -> vector<16x16xf32>
    %cst_16 = arith.constant 0.176776692 : f32
    %20 = vector.broadcast %cst_16 : f32 to vector<16x16xf32>
    %21 = arith.mulf %19, %20 : vector<16x16xf32>
    %cst_17 = arith.constant dense<0xFF800000> : vector<16xf32>
    %22 = vector.multi_reduction <maximumf>, %21, %cst_17 [1] : vector<16x16xf32> to vector<16xf32>
    %23 = vector.shape_cast %22 : vector<16xf32> to vector<16x1xf32>
    %24 = vector.broadcast %23 : vector<16x1xf32> to vector<16x16xf32>
    %25 = arith.subf %21, %24 : vector<16x16xf32>
    %26 = math.exp %25 : vector<16x16xf32>
    %cst_18 = arith.constant dense<0.000000e+00> : vector<16xf32>
    %27 = vector.multi_reduction <add>, %26, %cst_18 [1] : vector<16x16xf32> to vector<16xf32>
    %28 = vector.shape_cast %27 : vector<16xf32> to vector<16x1xf32>
    %29 = tpu.reciprocal %28 : vector<16x1xf32> -> vector<16x1xf32>
    %30 = vector.broadcast %29 : vector<16x1xf32> to vector<16x16xf32>
    %31 = arith.mulf %26, %30 : vector<16x16xf32>
    %cst_19 = arith.constant dense<0.000000e+00> : vector<16x8xf32>
    %32 = tpu.matmul %31, %18, %cst_19 {dimension_numbers = #tpu.dot_dimension_numbers<[1], [0], [0], [1], [0, 0, 1, 1], [], []>} : vector<16x16xf32>, vector<16x8xf32>, vector<16x8xf32> -> vector<16x8xf32>
    %c0_20 = arith.constant 0 : index
    %c0_21 = arith.constant 0 : index
    %c0_22 = arith.constant 0 : index
    %33 = vector.load %arg9[%c0_20, %c0_21, %c0_22] : memref<4x16x8xf32, #tpu.memory_space<vmem>>, vector<1x16x8xf32>
    %34 = vector.shape_cast %33 : vector<1x16x8xf32> to vector<16x8xf32>
    %35 = vector.shape_cast %32 : vector<16x8xf32> to vector<1x16x8xf32>
    tpu.vector_store %arg9[%c0_20, %c0_21, %c0_22], %35 {strides = array<i32>} : memref<4x16x8xf32, #tpu.memory_space<vmem>>, vector<1x16x8xf32>,
    %36 = vector.extract_strided_slice %5 {offsets = [16, 0], sizes = [16, 8], strides = [1, 1]} : vector<64x8xf32> to vector<16x8xf32>
    %37 = vector.extract_strided_slice %10 {offsets = [16, 0], sizes = [16, 8], strides = [1, 1]} : vector<64x8xf32> to vector<16x8xf32>
    %38 = vector.extract_strided_slice %15 {offsets = [16, 0], sizes = [16, 8], strides = [1, 1]} : vector<64x8xf32> to vector<16x8xf32>
    %cst_23 = arith.constant dense<0.000000e+00> : vector<16x16xf32>
    %39 = tpu.matmul %36, %37, %cst_23 {dimension_numbers = #tpu.dot_dimension_numbers<[1], [1], [0], [0], [0, 0, 1, 0], [], []>} : vector<16x8xf32>, vector<16x8xf32>, vector<16x16xf32> -> vector<16x16xf32>
    %cst_24 = arith.constant 0.176776692 : f32
    %40 = vector.broadcast %cst_24 : f32 to vector<16x16xf32>
    %41 = arith.mulf %39, %40 : vector<16x16xf32>
    %cst_25 = arith.constant dense<0xFF800000> : vector<16xf32>
    %42 = vector.multi_reduction <maximumf>, %41, %cst_25 [1] : vector<16x16xf32> to vector<16xf32>
    %43 = vector.shape_cast %42 : vector<16xf32> to vector<16x1xf32>
    %44 = vector.broadcast %43 : vector<16x1xf32> to vector<16x16xf32>
    %45 = arith.subf %41, %44 : vector<16x16xf32>
    %46 = math.exp %45 : vector<16x16xf32>
    %cst_26 = arith.constant dense<0.000000e+00> : vector<16xf32>
    %47 = vector.multi_reduction <add>, %46, %cst_26 [1] : vector<16x16xf32> to vector<16xf32>
    %48 = vector.shape_cast %47 : vector<16xf32> to vector<16x1xf32>
    %49 = tpu.reciprocal %48 : vector<16x1xf32> -> vector<16x1xf32>
    %50 = vector.broadcast %49 : vector<16x1xf32> to vector<16x16xf32>
    %51 = arith.mulf %46, %50 : vector<16x16xf32>
    %cst_27 = arith.constant dense<0.000000e+00> : vector<16x8xf32>
    %52 = tpu.matmul %51, %38, %cst_27 {dimension_numbers = #tpu.dot_dimension_numbers<[1], [0], [0], [1], [0, 0, 1, 1], [], []>} : vector<16x16xf32>, vector<16x8xf32>, vector<16x8xf32> -> vector<16x8xf32>
    %c1 = arith.constant 1 : index
    %c0_28 = arith.constant 0 : index
    %c0_29 = arith.constant 0 : index
    %53 = vector.load %arg9[%c1, %c0_28, %c0_29] : memref<4x16x8xf32, #tpu.memory_space<vmem>>, vector<1x16x8xf32>
    %54 = vector.shape_cast %53 : vector<1x16x8xf32> to vector<16x8xf32>
    %55 = vector.shape_cast %52 : vector<16x8xf32> to vector<1x16x8xf32>
    tpu.vector_store %arg9[%c1, %c0_28, %c0_29], %55 {strides = array<i32>} : memref<4x16x8xf32, #tpu.memory_space<vmem>>, vector<1x16x8xf32>,
    %56 = vector.extract_strided_slice %5 {offsets = [32, 0], sizes = [16, 8], strides = [1, 1]} : vector<64x8xf32> to vector<16x8xf32>
    %57 = vector.extract_strided_slice %10 {offsets = [32, 0], sizes = [16, 8], strides = [1, 1]} : vector<64x8xf32> to vector<16x8xf32>
    %58 = vector.extract_strided_slice %15 {offsets = [32, 0], sizes = [16, 8], strides = [1, 1]} : vector<64x8xf32> to vector<16x8xf32>
    %cst_30 = arith.constant dense<0.000000e+00> : vector<16x16xf32>
    %59 = tpu.matmul %56, %57, %cst_30 {dimension_numbers = #tpu.dot_dimension_numbers<[1], [1], [0], [0], [0, 0, 1, 0], [], []>} : vector<16x8xf32>, vector<16x8xf32>, vector<16x16xf32> -> vector<16x16xf32>
    %cst_31 = arith.constant 0.176776692 : f32
    %60 = vector.broadcast %cst_31 : f32 to vector<16x16xf32>
    %61 = arith.mulf %59, %60 : vector<16x16xf32>
    %cst_32 = arith.constant dense<0xFF800000> : vector<16xf32>
    %62 = vector.multi_reduction <maximumf>, %61, %cst_32 [1] : vector<16x16xf32> to vector<16xf32>
    %63 = vector.shape_cast %62 : vector<16xf32> to vector<16x1xf32>
    %64 = vector.broadcast %63 : vector<16x1xf32> to vector<16x16xf32>
    %65 = arith.subf %61, %64 : vector<16x16xf32>
    %66 = math.exp %65 : vector<16x16xf32>
    %cst_33 = arith.constant dense<0.000000e+00> : vector<16xf32>
    %67 = vector.multi_reduction <add>, %66, %cst_33 [1] : vector<16x16xf32> to vector<16xf32>
    %68 = vector.shape_cast %67 : vector<16xf32> to vector<16x1xf32>
    %69 = tpu.reciprocal %68 : vector<16x1xf32> -> vector<16x1xf32>
    %70 = vector.broadcast %69 : vector<16x1xf32> to vector<16x16xf32>
    %71 = arith.mulf %66, %70 : vector<16x16xf32>
    %cst_34 = arith.constant dense<0.000000e+00> : vector<16x8xf32>
    %72 = tpu.matmul %71, %58, %cst_34 {dimension_numbers = #tpu.dot_dimension_numbers<[1], [0], [0], [1], [0, 0, 1, 1], [], []>} : vector<16x16xf32>, vector<16x8xf32>, vector<16x8xf32> -> vector<16x8xf32>
    %c2 = arith.constant 2 : index
    %c0_35 = arith.constant 0 : index
    %c0_36 = arith.constant 0 : index
    %73 = vector.load %arg9[%c2, %c0_35, %c0_36] : memref<4x16x8xf32, #tpu.memory_space<vmem>>, vector<1x16x8xf32>
    %74 = vector.shape_cast %73 : vector<1x16x8xf32> to vector<16x8xf32>
    %75 = vector.shape_cast %72 : vector<16x8xf32> to vector<1x16x8xf32>
    tpu.vector_store %arg9[%c2, %c0_35, %c0_36], %75 {strides = array<i32>} : memref<4x16x8xf32, #tpu.memory_space<vmem>>, vector<1x16x8xf32>,
    %76 = vector.extract_strided_slice %5 {offsets = [48, 0], sizes = [16, 8], strides = [1, 1]} : vector<64x8xf32> to vector<16x8xf32>
    %77 = vector.extract_strided_slice %10 {offsets = [48, 0], sizes = [16, 8], strides = [1, 1]} : vector<64x8xf32> to vector<16x8xf32>
    %78 = vector.extract_strided_slice %15 {offsets = [48, 0], sizes = [16, 8], strides = [1, 1]} : vector<64x8xf32> to vector<16x8xf32>
    %cst_37 = arith.constant dense<0.000000e+00> : vector<16x16xf32>
    %79 = tpu.matmul %76, %77, %cst_37 {dimension_numbers = #tpu.dot_dimension_numbers<[1], [1], [0], [0], [0, 0, 1, 0], [], []>} : vector<16x8xf32>, vector<16x8xf32>, vector<16x16xf32> -> vector<16x16xf32>
    %cst_38 = arith.constant 0.176776692 : f32
    %80 = vector.broadcast %cst_38 : f32 to vector<16x16xf32>
    %81 = arith.mulf %79, %80 : vector<16x16xf32>
    %cst_39 = arith.constant dense<0xFF800000> : vector<16xf32>
    %82 = vector.multi_reduction <maximumf>, %81, %cst_39 [1] : vector<16x16xf32> to vector<16xf32>
    %83 = vector.shape_cast %82 : vector<16xf32> to vector<16x1xf32>
    %84 = vector.broadcast %83 : vector<16x1xf32> to vector<16x16xf32>
    %85 = arith.subf %81, %84 : vector<16x16xf32>
    %86 = math.exp %85 : vector<16x16xf32>
    %cst_40 = arith.constant dense<0.000000e+00> : vector<16xf32>
    %87 = vector.multi_reduction <add>, %86, %cst_40 [1] : vector<16x16xf32> to vector<16xf32>
    %88 = vector.shape_cast %87 : vector<16xf32> to vector<16x1xf32>
    %89 = tpu.reciprocal %88 : vector<16x1xf32> -> vector<16x1xf32>
    %90 = vector.broadcast %89 : vector<16x1xf32> to vector<16x16xf32>
    %91 = arith.mulf %86, %90 : vector<16x16xf32>
    %cst_41 = arith.constant dense<0.000000e+00> : vector<16x8xf32>
    %92 = tpu.matmul %91, %78, %cst_41 {dimension_numbers = #tpu.dot_dimension_numbers<[1], [0], [0], [1], [0, 0, 1, 1], [], []>} : vector<16x16xf32>, vector<16x8xf32>, vector<16x8xf32> -> vector<16x8xf32>
    %c3 = arith.constant 3 : index
    %c0_42 = arith.constant 0 : index
    %c0_43 = arith.constant 0 : index
    %93 = vector.load %arg9[%c3, %c0_42, %c0_43] : memref<4x16x8xf32, #tpu.memory_space<vmem>>, vector<1x16x8xf32>
    %94 = vector.shape_cast %93 : vector<1x16x8xf32> to vector<16x8xf32>
    %95 = vector.shape_cast %92 : vector<16x8xf32> to vector<1x16x8xf32>
    tpu.vector_store %arg9[%c3, %c0_42, %c0_43], %95 {strides = array<i32>} : memref<4x16x8xf32, #tpu.memory_space<vmem>>, vector<1x16x8xf32>,
    return
  }
  func.func @transform_0(%arg0: i32) -> (i32, i32) {
    %c0_i32 = arith.constant 0 : i32
    %c0_i32_0 = arith.constant 0 : i32
    %c0_i32_1 = arith.constant 0 : i32
    return %c0_i32, %c0_i32_0 : i32, i32
  }
  func.func @transform_1(%arg0: i32) -> (i32, i32) {
    %c0_i32 = arith.constant 0 : i32
    %c0_i32_0 = arith.constant 0 : i32
    %c0_i32_1 = arith.constant 0 : i32
    return %c0_i32, %c0_i32_0 : i32, i32
  }
  func.func @transform_2(%arg0: i32) -> (i32, i32) {
    %c0_i32 = arith.constant 0 : i32
    %c0_i32_0 = arith.constant 0 : i32
    %c0_i32_1 = arith.constant 0 : i32
    return %c0_i32, %c0_i32_0 : i32, i32
  }
  func.func @transform_3(%arg0: i32) -> (i32, i32) {
    %c0_i32 = arith.constant 0 : i32
    %c0_i32_0 = arith.constant 0 : i32
    %c0_i32_1 = arith.constant 0 : i32
    return %c0_i32, %c0_i32_0 : i32, i32
  }
  func.func @transform_4(%arg0: i32) -> (i32, i32) {
    %c0_i32 = arith.constant 0 : i32
    %c0_i32_0 = arith.constant 0 : i32
    %c0_i32_1 = arith.constant 0 : i32
    return %c0_i32, %c0_i32_0 : i32, i32
  }
  func.func @transform_5(%arg0: i32) -> (i32, i32) {
    %c0_i32 = arith.constant 0 : i32
    %c0_i32_0 = arith.constant 0 : i32
    %c0_i32_1 = arith.constant 0 : i32
    return %c0_i32, %c0_i32_0 : i32, i32
  }
  func.func @transform_6(%arg0: i32) -> (i32, i32) {
    %c0_i32 = arith.constant 0 : i32
    %c0_i32_0 = arith.constant 0 : i32
    %c0_i32_1 = arith.constant 0 : i32
    return %c0_i32, %c0_i32_0 : i32, i32
  }
  func.func @transform_7(%arg0: i32) -> (i32, i32, i32) {
    %c0_i32 = arith.constant 0 : i32
    %c0_i32_0 = arith.constant 0 : i32
    %c0_i32_1 = arith.constant 0 : i32
    %c0_i32_2 = arith.constant 0 : i32
    return %c0_i32, %c0_i32_0, %c0_i32_1 : i32, i32, i32
  }
  func.func @transform_8(%arg0: i32) -> (i32, i32, i32) {
    %c0_i32 = arith.constant 0 : i32
    %c0_i32_0 = arith.constant 0 : i32
    %c0_i32_1 = arith.constant 0 : i32
    %c0_i32_2 = arith.constant 0 : i32
    return %c0_i32, %c0_i32_0, %c0_i32_1 : i32, i32, i32
  }
}

</mosaic_0001>

<bundles_post_ra>
// kernel: tpu_custom_call.1
= control target key start
LH: loop header
LB: loop body
LE: loop exit
PB: predicated region body
PF: predicated region fallthrough
CT: control target
= control target key end

     0   :  { %vm48_vm0 = vcmask 261120   ;;  %vm410_vm1 = vcmask 64512   ;;  %vm500_vm3 = vcmask 130048   ;;  %s1792_s2 = inlined_call_operand.vmem [shape: f32[32,8], index: 2, kind: input, shape index: {}]   ;;  %s1793_s0 = inlined_call_operand.vmem [shape: f32[64,32], index: 0, kind: input, shape index: {}]   ;;  %s1794_s1 = inlined_call_operand.vmem [shape: f32[32,8], index: 1, kind: input, shape index: {}]   ;;  %s1795_s7 = inlined_call_operand.vmem [shape: s32[4,16,16], index: 7, kind: input, shape index: {}]   ;;  %s1796_s3 = inlined_call_operand.vmem [shape: f32[32,8], index: 3, kind: input, shape index: {}]   ;;  %s1797_s5 = inlined_call_operand.vmem [shape: f32[1,8], index: 5, kind: input, shape index: {}]   ;;  %s1798_s4 = inlined_call_operand.vmem [shape: f32[1,8], index: 4, kind: input, shape index: {}]   ;;  %s1799_s6 = inlined_call_operand.vmem [shape: f32[1,8], index: 6, kind: input, shape index: {}]   ;;  %s1800_s8 = inlined_call_operand.vmem [shape: f32[4,16,8], index: 8, kind: output, shape index: {}]  }
   0x1   :  { %v178_v0 = vld [vmem:[%s1792_s2] sm:$0xff]  ;;  %v179_v1 = vld [vmem:[%s1792_s2 + $0x8] sm:$0xff]  ;;  %v180_v2 = vld [vmem:[%s1792_s2 + $0x10] sm:$0xff] }
   0x2   :  { %v1444_v3 = vpack.c.bf16 %v179_v1, %v178_v0  ;;  %v181_v4 = vld [vmem:[%s1792_s2 + $0x18] sm:$0xff]  ;;  %v29_v5 = vld [vmem:[%s1793_s0] sm:$0xff]  ;;  %v38_v8 = vld [vmem:[%s1794_s1 + $0x8] sm:$0xff] }
   0x3   :  { %v1448_v6 = vpack.c.bf16 %v181_v4, %v180_v2  ;;  %1348 = vmatprep.mubr.msk.f32.mxu1 %vm48_vm0, %v29_v5  ;;  %v37_v7 = vld [vmem:[%s1794_s1] sm:$0xff]  ;;  %v39_v9 = vld [vmem:[%s1794_s1 + $0x10] sm:$0xff]  ;;  %1328 = vmatprep.mubr.msk.f32.mxu0 %vm48_vm0, %v29_v5  ;;  %v40_v11 = vld [vmem:[%s1794_s1 + $0x18] sm:$0xff] }
   0x4   :  { %1445 = vmatprep.subr.bf16.mxu1 %v1444_v3  ;;  %v1436_v10 = vpack.c.bf16 %v38_v8, %v37_v7  ;;  %v1440_v12 = vpack.c.bf16 %v40_v11, %v39_v9  ;;  %v30_v13 = vld [vmem:[%s1793_s0 + $0x8] sm:$0xff]  ;;  %v31_v14 = vld [vmem:[%s1793_s0 + $0x10] sm:$0xff]  ;;  %v32_v15 = vld [vmem:[%s1793_s0 + $0x18] sm:$0xff] }
   0x5   :  { %1447 = vmatpush3.bf16.msra.mxu1 %v1444_v3  ;;  %v33_v16 = vld [vmem:[%s1793_s0 + $0x20] sm:$0xff]  ;;  %v34_v17 = vld [vmem:[%s1793_s0 + $0x28] sm:$0xff]  ;;  %v296_v21 = vld [vmem:[%s1796_s3 + $0x10] sm:$0xff] }
   0x6   :  { %1449 = vmatprep.subr.bf16.mxu1 %v1448_v6  ;;  %1437 = vmatprep.subr.bf16.mxu0 %v1436_v10  ;;  %v294_v18 = vld [vmem:[%s1796_s3] sm:$0xff]  ;;  %v295_v19 = vld [vmem:[%s1796_s3 + $0x8] sm:$0xff]  ;;  %v297_v22 = vld [vmem:[%s1796_s3 + $0x18] sm:$0xff] }
   0x7   :  { %1439 = vmatpush3.bf16.msra.mxu0 %v1436_v10  ;;  %v1452_v20 = vpack.c.bf16 %v295_v19, %v294_v18  ;;  %v35_v23 = vld [vmem:[%s1793_s0 + $0x30] sm:$0xff]  ;;  %v1456_v24 = vpack.c.bf16 %v297_v22, %v296_v21  ;;  %v36_v25 = vld [vmem:[%s1793_s0 + $0x38] sm:$0xff]  ;;  %v1204_v26 = vld [vmem:[%s1797_s5] ss:$0 sm:$0xff] }
   0x8   :  { %1441 = vmatprep.subr.bf16.mxu0 %v1440_v12  ;;  %v1667_v30 = vld [vmem:[%s1798_s4] ss:$0 sm:$0xff]  ;;  %vm1671_vm2 = vmpackc.low %vm410_vm1, %vm410_vm1 }
   0x9   :  { %1451 = vmatpush3.bf16.msra.mxu1 %v1448_v6  ;;  %v1694_v54 = vld [vmem:[%s1799_s6] ss:$0 sm:$0xff] }
   0xb   :  { %1443 = vmatpush3.bf16.msra.mxu0 %v1440_v12 }
   0xc   :  { %1349 = vmatmul.mubr.msk.f32.vlgmr.msra.gmra.mrb[0].mxu1 %vm48_vm0, %v30_v13  ;;  %1453 = vmatprep.subr.bf16.mxu0 %v1452_v20 }
   0xd   :  { %1351 = vmatprep.mubr.msk.f32.mxu1 %vm48_vm0, %v31_v14 }
   0xe   :  { %1329 = vmatmul.mubr.msk.f32.vlgmr.msra.gmra.mrb[0].mxu0 %vm48_vm0, %v30_v13 }
   0xf   :  { %1331 = vmatprep.mubr.msk.f32.mxu0 %vm48_vm0, %v31_v14  ;;  %1455 = vmatpush3.bf16.msra.mxu0 %v1452_v20 }
  0x10   :  { %1352 = vmatmul.mubr.msk.f32.gmra.mrb[2].mxu1 %vm48_vm0, %v32_v15  ;;  %1457 = vmatprep.subr.bf16.mxu0 %v1456_v24 }
  0x11   :  { %1354 = vmatprep.mubr.msk.f32.mxu1 %vm48_vm0, %v33_v16 }
  0x12   :  { %1332 = vmatmul.mubr.msk.f32.gmra.mrb[2].mxu0 %vm48_vm0, %v32_v15 }
  0x13   :  { %1334 = vmatprep.mubr.msk.f32.mxu0 %vm48_vm0, %v33_v16  ;;  %1459 = vmatpush3.bf16.msra.mxu0 %v1456_v24 }
  0x14   :  { %1355 = vmatmul.mubr.msk.f32.gmra.mrb[4].mxu1 %vm48_vm0, %v34_v17 }
  0x15   :  { %1357 = vmatprep.mubr.msk.f32.mxu1 %vm48_vm0, %v35_v23 }
  0x16   :  { %1335 = vmatmul.mubr.msk.f32.gmra.mrb[4].mxu0 %vm48_vm0, %v34_v17 }
  0x17   :  { %1337 = vmatprep.mubr.msk.f32.mxu0 %vm48_vm0, %v35_v23 }
  0x18   :  { %1358 = vmatmul.mubr.msk.f32.gmra.mrb[6].mxu1 %vm48_vm0, %v36_v25 }
  0x1a   :  { %1338 = vmatmul.mubr.msk.f32.gmra.mrb[6].mxu0 %vm48_vm0, %v36_v25 }
  0x1b   :  { %1368 = vmatprep.mubr.msk.f32.mxu0 %vm48_vm0, %v29_v5 }
  0x1e   :  { %1369 = vmatmul.mubr.msk.f32.vlgmr.msra.gmra.mrb[8].mxu0 %vm48_vm0, %v30_v13 }
  0x1f   :  { %1371 = vmatprep.mubr.msk.f32.mxu0 %vm48_vm0, %v31_v14 }
  0x22   :  { %1372 = vmatmul.mubr.msk.f32.gmra.mrb[10].mxu0 %vm48_vm0, %v32_v15 }
  0x23   :  { %1374 = vmatprep.mubr.msk.f32.mxu0 %vm48_vm0, %v33_v16 }
  0x26   :  { %1375 = vmatmul.mubr.msk.f32.gmra.mrb[12].mxu0 %vm48_vm0, %v34_v17 }
  0x27   :  { %1377 = vmatprep.mubr.msk.f32.mxu0 %vm48_vm0, %v35_v23 }
  0x2a   :  { %1378 = vmatmul.mubr.msk.f32.gmra.mrb[14].mxu0 %vm48_vm0, %v36_v25 }
  0xdf   :  { %v1350_v27 = vpop.f32.mrb[0].mxu1 }
  0xe0   :  { %v261_v28 = vadd.f32 %v1350_v27, %v1204_v26  ;;  %v255_v29 = vpop.f32.mrb[1].mxu1 }
  0xe1   :  { %v256_v31 = vadd.f32 %v1204_v26, %v255_v29  ;;  %v1330_v32 = vpop.f32.mrb[0].mxu0 }
  0xe2   :  { %v139_v34 = vpop.f32.mrb[1].mxu0  ;;  %v145_v50 = vadd.f32 %v1330_v32, %v1667_v30 }
  0xe3   :  { %v1460_v35 = vpack.c.bf16 %v261_v28, %v256_v31  ;;  %v140_v36 = vadd.f32 %v1667_v30, %v139_v34  ;;  %v1353_v37 = vpop.f32.mrb[2].mxu1 }
  0xe4   :  { %v271_v38 = vadd.f32 %v1353_v37, %v1204_v26  ;;  %v265_v39 = vpop.f32.mrb[3].mxu1 }
  0xe5   :  { %1462 = vmatprep.subr.msk.bf16.mxu1 %vm1671_vm2, %v1460_v35  ;;  %1384 = vmatprep.mubr.msk.f32.mxu1 %vm410_vm1, %v140_v36  ;;  %v1679_v40 = vpop.f32.mrb[2].mxu0  ;;  %v266_v41 = vadd.f32 %v1204_v26, %v265_v39 }
  0xe6   :  { %1465 = vmatpush3.bf16.xpose.msk.msra.mxu1 %vm1671_vm2, %v1460_v35  ;;  %v149_v42 = vpop.f32.mrb[3].mxu0  ;;  %v155_v24 = vadd.f32 %v1679_v40, %v1667_v30 }
  0xe7   :  { %v1470_v43 = vpack.c.bf16 %v271_v38, %v266_v41  ;;  %v1356_v44 = vpop.f32.mrb[4].mxu1  ;;  %v150_v23 = vadd.f32 %v1667_v30, %v149_v42 }
  0xe8   :  { %v281_v45 = vadd.f32 %v1356_v44, %v1204_v26  ;;  %v275_v46 = vpop.f32.mrb[5].mxu1 }
  0xe9   :  { %v1683_v47 = vpop.f32.mrb[4].mxu0  ;;  %v276_v48 = vadd.f32 %v1204_v26, %v275_v46 }
  0xea   :  { %v159_v49 = vpop.f32.mrb[5].mxu0 }
  0xeb   :  { %v1480_v51 = vpack.c.bf16 %v281_v45, %v276_v48  ;;  %v1359_v55 = vpop.f32.mrb[6].mxu1  ;;  %v160_v25 = vadd.f32 %v1667_v30, %v159_v49 }
  0xec   :  { %v291_v56 = vadd.f32 %v1359_v55, %v1204_v26  ;;  %v285_v57 = vpop.f32.mrb[7].mxu1 }
  0xed   :  { %1385 = vmatmul.mubr.msk.f32.vlgmr.msra.gmra.mrb[8].mxu1 %vm410_vm1, %v145_v50  ;;  %v1687_v52 = vpop.f32.mrb[6].mxu0  ;;  %v286_v59 = vadd.f32 %v1204_v26, %v285_v57  ;;  %v165_v26 = vadd.f32 %v1683_v47, %v1667_v30 }
  0xee   :  { %v1689_v53 = vpop.f32.mrb[7].mxu0 }
  0xef   :  { %v1698_v63 = vpack.c.bf16 %v291_v56, %v286_v59 }
  0xf1   :  { %v1370_v58 = vpop.f32.mrb[8].mxu0 }
  0xf2   :  { %v377_v60 = vadd.f32 %v1370_v58, %v1694_v54  ;;  %v371_v61 = vpop.f32.mrb[9].mxu0 }
  0xf3   :  { %v372_v62 = vadd.f32 %v1694_v54, %v371_v61 }
  0xf5   :  { %v1466_v0 = vpack.c.bf16 %v377_v60, %v372_v62 }
  0xf7   :  { %1467 = vmatprep.subr.bf16.mxu1 %v1466_v0 }
  0xf8   :  { %1469 = vmatpush3.bf16.msra.mxu1 %v1466_v0 }
  0xf9   :  { %1472 = vmatprep.subr.msk.bf16.mxu1 %vm1671_vm2, %v1470_v43 }
 0x1c0   :  { %v1386_v1 = vpop.f32.mrb[8].mxu1 }
 0x1c1   :  { %v489_v2 = vpop.f32.mrb[9].mxu1  ;;  %v499_v4 = vmul.f32 0.17677669, %v1386_v1 }
 0x1c2   :  { %v498_v3 = vmul.f32 0.17677669, %v489_v2 }
 0x1c3   :  { %v504_v6 = vsel %vm500_vm3, %v499_v4, -inf }
 0x1c4   :  { %v501_v5 = vsel %vm500_vm3, %v498_v3, -inf }
 0x1c5   :  { %502 = vmax.xlane.f32.xlu0 %v501_v5 }
 0x1c9   :  { %505 = vmax.xlane.f32.xlu0 %v504_v6 }
 0x252   :  { %v503_v7 = vpop.xlane.xlu0 %502 }
 0x253   :  { %v507_v8 = vsub.f32 %v498_v3, %v503_v7 }
 0x255   :  { %v509_v9 = vmul.f32 1.442695, %v507_v8 }
 0x256   :  { %v506_v10 = vpop.xlane.xlu0 %505 }
 0x257   :  { %1500 = vpow2.f32 %v509_v9  ;;  %v508_v11 = vsub.f32 %v499_v4, %v506_v10 }
 0x259   :  { %v511_v12 = vmul.f32 1.442695, %v508_v11 }
 0x25b   :  { %1502 = vpow2.f32 %v511_v12 }
 0x261   :  { %v1501_v13 = vpop.eup %1500 }
 0x262   :  { %v513_v14 = vsel %vm500_vm3, %v1501_v13, 0.0 }
 0x263   :  { %514 = vadd.xlane.f32.xlu1 %v513_v14 }
 0x265   :  { %v1503_v15 = vpop.eup %1502 }
 0x266   :  { %v516_v16 = vsel %vm500_vm3, %v1503_v15, 0.0 }
 0x267   :  { %517 = vadd.xlane.f32.xlu1 %v516_v16 }
 0x2f0   :  { %v515_v17 = vpop.xlane.xlu1 %514 }
 0x2f1   :  { %1504 = vrcp.f32 %v515_v17 }
 0x2f4   :  { %v518_v18 = vpop.xlane.xlu1 %517 }
 0x2f5   :  { %1506 = vrcp.f32 %v518_v18 }
 0x2fb   :  { %v1505_v19 = vpop.eup %1504 }
 0x2fc   :  { %v521_v20 = vmul.f32 %v1505_v19, %v1501_v13 }
 0x2fe   :  { %1391 = vmatprep.mubr.msk.f32.mxu1 %vm500_vm3, %v521_v20 }
 0x2ff   :  { %v1507_v21 = vpop.eup %1506 }
 0x300   :  { %v522_v22 = vmul.f32 %v1507_v21, %v1503_v15 }
 0x302   :  { %1392 = vmatmul.mubr.msk.f32.vlgmr.msra.gmra.mrb[10].mxu1 %vm500_vm3, %v522_v22 }
 0x303   :  { %1475 = vmatpush3.bf16.xpose.msk.msra.mxu1 %vm1671_vm2, %v1470_v43  ;;  %1398 = vmatprep.mubr.msk.f32.mxu1 %vm410_vm1, %v150_v23  ;;  %v1373_v43 = vpop.f32.mrb[10].mxu0 }
 0x304   :  { %1482 = vmatprep.subr.msk.bf16.mxu1 %vm1671_vm2, %v1480_v51  ;;  %v387_v4 = vadd.f32 %v1373_v43, %v1694_v54  ;;  %v381_v5 = vpop.f32.mrb[11].mxu0 }
 0x305   :  { %v382_v6 = vadd.f32 %v1694_v54, %v381_v5  ;;  %v1376_v8 = vpop.f32.mrb[12].mxu0 }
 0x306   :  { %v391_v9 = vpop.f32.mrb[13].mxu0  ;;  %v397_v10 = vadd.f32 %v1376_v8, %v1694_v54 }
 0x307   :  { %v1476_v7 = vpack.c.bf16 %v387_v4, %v382_v6  ;;  %v392_v11 = vadd.f32 %v1694_v54, %v391_v9  ;;  %v1379_v13 = vpop.f32.mrb[14].mxu0 }
 0x308   :  { %v407_v14 = vadd.f32 %v1379_v13, %v1694_v54  ;;  %v401_v15 = vpop.f32.mrb[15].mxu0 }
 0x309   :  { %1477 = vmatprep.subr.bf16.mxu0 %v1476_v7  ;;  %v1486_v12 = vpack.c.bf16 %v397_v10, %v392_v11  ;;  %v402_v16 = vadd.f32 %v1694_v54, %v401_v15 }
 0x30a   :  { %1399 = vmatmul.mubr.msk.f32.vlgmr.msra.gmra.mrb[12].mxu1 %vm410_vm1, %v155_v24  ;;  %1479 = vmatpush3.bf16.msra.mxu0 %v1476_v7 }
 0x30b   :  { %1485 = vmatpush3.bf16.xpose.msk.msra.mxu1 %vm1671_vm2, %v1480_v51  ;;  %1412 = vmatprep.mubr.msk.f32.mxu1 %vm410_vm1, %v160_v25  ;;  %v1496_v17 = vpack.c.bf16 %v407_v14, %v402_v16 }
 0x30c   :  { %1487 = vmatprep.subr.bf16.mxu0 %v1486_v12 }
 0x30d   :  { %1497 = vmatprep.subr.bf16.mxu1 %v1496_v17 }
 0x312   :  { %1413 = vmatmul.mubr.msk.f32.vlgmr.msra.gmra.mrb[14].mxu1 %vm410_vm1, %v165_v26 }
 0x313   :  { %1499 = vmatpush3.bf16.msra.mxu1 %v1496_v17 }
 0x3d5   :  { %v1393_v27 = vpop.f32.mrb[10].mxu1 }
 0x3d6   :  { %605 = vst.msk [vmem:[%s1800_s8 + $0x8] sm:$0xff] %vm410_vm1, %v1393_v27  ;;  %v595_v28 = vpop.f32.mrb[11].mxu1 }
 0x3d7   :  { %604 = vst.msk [vmem:[%s1800_s8] sm:$0xff] %vm410_vm1, %v595_v28 }
 0x3dd   :  { %v1400_v29 = vpop.f32.mrb[12].mxu1 }
 0x3de   :  { %v694_v31 = vmul.f32 0.17677669, %v1400_v29  ;;  %v684_v32 = vpop.f32.mrb[13].mxu1  ;;  %v170_v29 = vadd.f32 %v1667_v30, %v1689_v53 }
 0x3df   :  { %v693_v34 = vmul.f32 0.17677669, %v684_v32 }
 0x3e0   :  { %v698_v35 = vsel %vm500_vm3, %v694_v31, -inf }
 0x3e1   :  { %699 = vmax.xlane.f32.xlu1 %v698_v35  ;;  %v695_v36 = vsel %vm500_vm3, %v693_v34, -inf }
 0x3e2   :  { %696 = vmax.xlane.f32.xlu0 %v695_v36 }
 0x3e5   :  { %v1414_v37 = vpop.f32.mrb[14].mxu1 }
 0x3e6   :  { %v889_v38 = vmul.f32 0.17677669, %v1414_v37  ;;  %v879_v39 = vpop.f32.mrb[15].mxu1 }
 0x3e7   :  { %v888_v40 = vmul.f32 0.17677669, %v879_v39 }
 0x3e8   :  { %v893_v41 = vsel %vm500_vm3, %v889_v38, -inf }
 0x3e9   :  { %894 = vmax.xlane.f32.xlu1 %v893_v41  ;;  %v890_v42 = vsel %vm500_vm3, %v888_v40, -inf }
 0x3ea   :  { %891 = vmax.xlane.f32.xlu0 %v890_v42 }
 0x46e   :  { %v700_v44 = vpop.xlane.xlu1 %699 }
 0x46f   :  { %v702_v45 = vsub.f32 %v694_v31, %v700_v44  ;;  %v697_v46 = vpop.xlane.xlu0 %696  ;;  %v175_v31 = vadd.f32 %v1687_v52, %v1667_v30 }
 0x470   :  { %v701_v47 = vsub.f32 %v693_v34, %v697_v46 }
 0x471   :  { %v705_v48 = vmul.f32 1.442695, %v702_v45 }
 0x472   :  { %v703_v49 = vmul.f32 1.442695, %v701_v47 }
 0x473   :  { %1508 = vpow2.f32 %v705_v48 }
 0x474   :  { %1510 = vpow2.f32 %v703_v49 }
 0x476   :  { %v895_v50 = vpop.xlane.xlu1 %894 }
 0x477   :  { %v897_v51 = vsub.f32 %v889_v38, %v895_v50  ;;  %v892_v55 = vpop.xlane.xlu0 %891 }
 0x478   :  { %v896_v56 = vsub.f32 %v888_v40, %v892_v55 }
 0x479   :  { %v900_v57 = vmul.f32 1.442695, %v897_v51 }
 0x47a   :  { %v898_v58 = vmul.f32 1.442695, %v896_v56 }
 0x47b   :  { %1512 = vpow2.f32 %v900_v57 }
 0x47c   :  { %1514 = vpow2.f32 %v898_v58 }
 0x47d   :  { %v1509_v59 = vpop.eup %1508 }
 0x47e   :  { %v1511_v60 = vpop.eup %1510  ;;  %v710_v61 = vsel %vm500_vm3, %v1509_v59, 0.0 }
 0x47f   :  { %711 = vadd.xlane.f32.xlu1 %v710_v61  ;;  %v707_v62 = vsel %vm500_vm3, %v1511_v60, 0.0 }
 0x480   :  { %708 = vadd.xlane.f32.xlu0 %v707_v62 }
 0x485   :  { %v1513_v0 = vpop.eup %1512 }
 0x486   :  { %v1515_v1 = vpop.eup %1514  ;;  %v905_v2 = vsel %vm500_vm3, %v1513_v0, 0.0 }
 0x487   :  { %906 = vadd.xlane.f32.xlu1 %v905_v2  ;;  %v902_v3 = vsel %vm500_vm3, %v1515_v1, 0.0 }
 0x488   :  { %903 = vadd.xlane.f32.xlu0 %v902_v3 }
 0x50c   :  { %v712_v18 = vpop.xlane.xlu1 %711 }
 0x50d   :  { %1516 = vrcp.f32 %v712_v18  ;;  %v709_v19 = vpop.xlane.xlu0 %708 }
 0x50e   :  { %1518 = vrcp.f32 %v709_v19 }
 0x514   :  { %v907_v20 = vpop.xlane.xlu1 %906 }
 0x515   :  { %1520 = vrcp.f32 %v907_v20  ;;  %v904_v21 = vpop.xlane.xlu0 %903 }
 0x516   :  { %1522 = vrcp.f32 %v904_v21 }
 0x517   :  { %v1517_v22 = vpop.eup %1516 }
 0x518   :  { %v1519_v23 = vpop.eup %1518  ;;  %v716_v25 = vmul.f32 %v1517_v22, %v1509_v59 }
 0x519   :  { %v715_v24 = vmul.f32 %v1519_v23, %v1511_v60 }
 0x51b   :  { %1405 = vmatprep.mubr.msk.f32.mxu0 %vm500_vm3, %v715_v24 }
 0x51c   :  { %1406 = vmatmul.mubr.msk.f32.vlgmr.msra.gmra.mrb[16].mxu0 %vm500_vm3, %v716_v25 }
 0x51d   :  { %1489 = vmatpush3.bf16.msra.mxu0 %v1486_v12 }
 0x51e   :  { %1492 = vmatprep.subr.msk.bf16.mxu0 %vm1671_vm2, %v1698_v63 }
 0x51f   :  { %v1521_v54 = vpop.eup %1520 }
 0x520   :  { %v1523_v26 = vpop.eup %1522  ;;  %v911_v28 = vmul.f32 %v1521_v54, %v1513_v0 }
 0x521   :  { %v910_v27 = vmul.f32 %v1523_v26, %v1515_v1 }
 0x523   :  { %1419 = vmatprep.mubr.msk.f32.mxu0 %vm500_vm3, %v910_v27 }
 0x524   :  { %1420 = vmatmul.mubr.msk.f32.vlgmr.msra.gmra.mrb[18].mxu0 %vm500_vm3, %v911_v28 }
 0x525   :  { %1426 = vmatprep.mubr.msk.f32.mxu0 %vm410_vm1, %v170_v29 }
 0x526   :  { %1495 = vmatpush3.bf16.xpose.msk.msra.mxu0 %vm1671_vm2, %v1698_v63 }
 0x52d   :  { %1427 = vmatmul.mubr.msk.f32.vlgmr.msra.gmra.mrb[20].mxu0 %vm410_vm1, %v175_v31 }
 0x5ef   :  { %v1407_v32 = vpop.f32.mrb[16].mxu0 }
 0x5f0   :  { %1235 = vst.msk [vmem:[%s1800_s8 + $0x18] sm:$0xff] %vm410_vm1, %v1407_v32  ;;  %v789_v53 = vpop.f32.mrb[17].mxu0 }
 0x5f1   :  { %1234 = vst.msk [vmem:[%s1800_s8 + $0x10] sm:$0xff] %vm410_vm1, %v789_v53 }
 0x5f7   :  { %v1421_v34 = vpop.f32.mrb[18].mxu0 }
 0x5f8   :  { %1243 = vst.msk [vmem:[%s1800_s8 + $0x28] sm:$0xff] %vm410_vm1, %v1421_v34  ;;  %v984_v30 = vpop.f32.mrb[19].mxu0 }
 0x5f9   :  { %1242 = vst.msk [vmem:[%s1800_s8 + $0x20] sm:$0xff] %vm410_vm1, %v984_v30 }
 0x600   :  { %v1428_v33 = vpop.f32.mrb[20].mxu0 }
 0x601   :  { %v1084_v52 = vmul.f32 0.17677669, %v1428_v33  ;;  %v1074_v63 = vpop.f32.mrb[21].mxu0 }
 0x602   :  { %v1083_v35 = vmul.f32 0.17677669, %v1074_v63 }
 0x603   :  { %v1088_v36 = vsel %vm500_vm3, %v1084_v52, -inf }
 0x604   :  { %1089 = vmax.xlane.f32.xlu1 %v1088_v36  ;;  %v1085_v37 = vsel %vm500_vm3, %v1083_v35, -inf }
 0x605   :  { %1086 = vmax.xlane.f32.xlu0 %v1085_v37 }
 0x691   :  { %v1090_v38 = vpop.xlane.xlu1 %1089 }
 0x692   :  { %v1092_v39 = vsub.f32 %v1084_v52, %v1090_v38  ;;  %v1087_v40 = vpop.xlane.xlu0 %1086 }
 0x693   :  { %v1091_v41 = vsub.f32 %v1083_v35, %v1087_v40 }
 0x694   :  { %v1095_v42 = vmul.f32 1.442695, %v1092_v39 }
 0x695   :  { %v1093_v43 = vmul.f32 1.442695, %v1091_v41 }
 0x696   :  { %1524 = vpow2.f32 %v1095_v42 }
 0x697   :  { %1526 = vpow2.f32 %v1093_v43 }
 0x6a0   :  { %v1525_v44 = vpop.eup %1524 }
 0x6a1   :  { %v1527_v45 = vpop.eup %1526  ;;  %v1100_v46 = vsel %vm500_vm3, %v1525_v44, 0.0 }
 0x6a2   :  { %1101 = vadd.xlane.f32.xlu1 %v1100_v46  ;;  %v1097_v47 = vsel %vm500_vm3, %v1527_v45, 0.0 }
 0x6a3   :  { %1098 = vadd.xlane.f32.xlu0 %v1097_v47 }
 0x72f   :  { %v1102_v48 = vpop.xlane.xlu1 %1101 }
 0x730   :  { %1528 = vrcp.f32 %v1102_v48  ;;  %v1099_v49 = vpop.xlane.xlu0 %1098 }
 0x731   :  { %1530 = vrcp.f32 %v1099_v49 }
 0x73a   :  { %v1529_v50 = vpop.eup %1528 }
 0x73b   :  { %v1531_v51 = vpop.eup %1530  ;;  %v1106_v56 = vmul.f32 %v1529_v50, %v1525_v44 }
 0x73c   :  { %v1105_v55 = vmul.f32 %v1531_v51, %v1527_v45 }
 0x73e   :  { %1433 = vmatprep.mubr.msk.f32.mxu1 %vm500_vm3, %v1105_v55 }
 0x73f   :  { %1434 = vmatmul.mubr.msk.f32.vlgmr.msra.gmra.mrb[16].mxu1 %vm500_vm3, %v1106_v56 }
 0x812   :  { %v1435_v57 = vpop.f32.mrb[16].mxu1 }
 0x813   :  { %1251 = vst.msk [vmem:[%s1800_s8 + $0x38] sm:$0xff] %vm410_vm1, %v1435_v57  ;;  %v1179_v58 = vpop.f32.mrb[17].mxu1 }
 0x814   :  { %1250 = vst.msk [vmem:[%s1800_s8 + $0x30] sm:$0xff] %vm410_vm1, %v1179_v58 }

</bundles_post_ra>
